<compile_context>
chip_gen: v7x
topology: tpu7x:2x2x1
jax: 0.10.0
libtpu: 0.0.40
codegen_flags: <defaults>
</compile_context>

<pallas_src>
import functools

import jax
import jax.numpy as jnp
from jax.experimental import pallas as pl
from jax.experimental.pallas import tpu as pltpu

_MIB = 1024 * 1024


def _row_align(dtype):
    """Sublane alignment for the row tile: 8 rows of 32-bit, 16 of bf16, 32 of int8."""
    return max(8, 32 // jnp.dtype(dtype).itemsize)


def _round_up(x, m):
    return ((x + m - 1) // m) * m


def _vmem_budget_bytes():
    """Per-generation scoped-VMEM budget we request from the compiler."""
    phys = 64 * _MIB                      # conservative default (v7x physical VMEM)
    try:
        info = pltpu.get_tpu_info()
        phys = int(getattr(info, "vmem_capacity_bytes", phys))
    except Exception:
        pass
    # <= ~48 MiB on 64 MiB parts (v7x), 64 MiB on 128 MiB parts (v5e/v6e).
    return min(64 * _MIB, (phys * 3) // 4)


def _labels_for_rows(row0, tm, batch, n_total):
    """label[i] = (batch + i) % n_total without a vector integer modulo."""
    row = jax.lax.broadcasted_iota(jnp.int32, (tm, 1), 0) + row0     # (TM, 1)
    t = row + batch
    label = jnp.where(t >= n_total, t - n_total, t)                  # (TM, 1)
    return row, label


def _nce_loss_rows_kernel(sim_ref, out_ref, *, n_total, batch, tm):
    """Single pass over a (TM, C) row block; the full class axis is in VMEM."""
    row0 = pl.program_id(0) * tm
    row, label = _labels_for_rows(row0, tm, batch, n_total)

    x = sim_ref[...]                                      # (TM, C), input dtype
    c = x.shape[-1]
    col = jax.lax.broadcasted_iota(jnp.int32, (tm, c), 1)

    # Label logit: one-hot select + reduce in the input dtype (exact -- exactly
    # one non-zero per row), cast to f32 afterwards.
    zero = jnp.zeros((), dtype=x.dtype)
    tgt = jnp.sum(jnp.where(col == label, x, zero),
                  axis=-1, keepdims=True).astype(jnp.float32)        # (TM, 1)

    # Numerically-stable logsumexp; row-max in the input dtype (exact), the
    # subtraction / exp / accumulation in f32.
    m = jnp.max(x, axis=-1, keepdims=True).astype(jnp.float32)       # (TM, 1)
    s = jnp.sum(jnp.exp(x.astype(jnp.float32) - m), axis=-1, keepdims=True)
    per_row = (m + jnp.log(s)) - tgt                                  # (TM, 1)

    # Padded tail rows (N % TM != 0) read block padding; everything above is
    # row-contained, so a per-row select here is sufficient (traced only when
    # a partial row tile exists).
    if n_total % tm != 0:
        per_row = jnp.where(row < n_total, per_row, jnp.zeros_like(per_row))

    partial = jnp.sum(per_row, axis=0, keepdims=True)                 # (1, 1)
    out_ref[...] = jnp.broadcast_to(partial.reshape(1, 1, 1), out_ref.shape)


def _nce_loss_online_kernel(sim_ref, out_ref, m_ref, l_ref, tgt_ref, *,
                            n_total, batch, c_total, tm, tc, n_col_tiles):
    """Online (flash-style) logsumexp over column tiles of width TC."""
    i = pl.program_id(0)
    j = pl.program_id(1)
    row0 = i * tm
    row, label = _labels_for_rows(row0, tm, batch, n_total)
    col = jax.lax.broadcasted_iota(jnp.int32, (tm, tc), 1)

    @pl.when(j == 0)
    def _():
        m_ref[...] = jnp.full_like(m_ref, -jnp.inf)
        l_ref[...] = jnp.zeros_like(l_ref)
        tgt_ref[...] = jnp.zeros_like(tgt_ref)

    x = sim_ref[...]                                      # (TM, TC), input dtype

    def accumulate(valid_cols):
        # Label-logit contribution from this column tile (labels < N <= C, so
        # they never point into block padding -- no column mask needed here).
        zero = jnp.zeros((), dtype=x.dtype)
        label_local = label - j * tc
        tgt_ref[...] += jnp.sum(jnp.where(col == label_local, x, zero),
                                axis=-1, keepdims=True).astype(jnp.float32)

        xm = x
        if valid_cols is not None:        # only traced for the last column tile
            neg_inf = jnp.array(-jnp.inf, dtype=x.dtype)
            xm = jnp.where(col < valid_cols, x, neg_inf)

        tile_max = jnp.max(xm, axis=-1, keepdims=True).astype(jnp.float32)
        m_old = m_ref[...]
        m_new = jnp.maximum(m_old, tile_max)
        p_sum = jnp.sum(jnp.exp(xm.astype(jnp.float32) - m_new),
                        axis=-1, keepdims=True)
        l_ref[...] = jnp.exp(m_old - m_new) * l_ref[...] + p_sum
        m_ref[...] = m_new

    if c_total % tc == 0:
        accumulate(None)
    else:
        # Gate the column-tail masking on the last column tile only.
        is_last_col = j == n_col_tiles - 1
        last_valid = c_total - (n_col_tiles - 1) * tc

        @pl.when(jnp.logical_not(is_last_col))
        def _():
            accumulate(None)

        @pl.when(is_last_col)
        def _():
            accumulate(last_valid)

    @pl.when(j == n_col_tiles - 1)
    def _():
        per_row = (m_ref[...] + jnp.log(l_ref[...])) - tgt_ref[...]   # (TM, 1)
        if n_total % tm != 0:
            per_row = jnp.where(row < n_total, per_row, jnp.zeros_like(per_row))
        partial = jnp.sum(per_row, axis=0, keepdims=True)             # (1, 1)
        out_ref[...] = jnp.broadcast_to(partial.reshape(1, 1, 1), out_ref.shape)


def _choose_tiles(n, c, dtype, tm, tc, budget):
    itemsize = jnp.dtype(dtype).itemsize
    align = _row_align(dtype)
    # Per-element working set: double-buffered input block + f32/int32
    # intermediates (x.astype(f32), exp(x-m), col iota, one-hot select) that
    # may be live at once inside one grid step.
    per_elem = 2 * itemsize + 16
    usable = (budget * 3) // 5            # leave headroom for output/compiler scratch

    # Column tiling only when a full-C row block (at minimum row height) does
    # not fit; the online path then also removes the big per-row temporaries.
    if tc is None:
        if align * c * per_elem <= usable:
            tc = c
        else:
            target_rows = max(align, 256)
            tc = usable // (target_rows * per_elem)
    tc = int(tc)
    if tc < c:
        tc = max(128, (tc // 128) * 128)  # lane-tile multiple
    if tc >= c:
        tc = c

    if tm is None:
        tm = usable // max(1, tc * per_elem)
        tm = max(align, (tm // align) * align)
        tm = min(tm, 1024)                # diminishing returns past ~1k rows/step
    else:
        tm = max(align, (int(tm) // align) * align)

    # Keep >= 2 row tiles so the "parallel" axis can split across v7x's two
    # TensorCores (free on v5e/v6e: just one extra cheap grid step).
    half = _round_up(-(-n // 2), align)
    tm = min(tm, half)
    if tm >= n:
        tm = n
    return tm, tc


def nce_softmax_loss(similarity, *, tm=None, tc=None):
    """similarity: (2B, C) array (f32 or bf16), C >= 2B. Returns scalar f32 loss."""
    n, c = similarity.shape
    if n % 2 != 0:
        raise ValueError("similarity must have an even number of rows (2*batch).")
    if c < n:
        raise ValueError("labels index columns 0..2B-1; need C >= 2B.")
    batch = n // 2

    budget = _vmem_budget_bytes()
    tm, tc = _choose_tiles(n, c, similarity.dtype, tm, tc, budget)
    n_row_tiles = -(-n // tm)
    n_col_tiles = -(-c // tc)

    compiler_params = pltpu.CompilerParams(
        dimension_semantics=(("parallel",) if n_col_tiles == 1
                             else ("parallel", "arbitrary")),
        vmem_limit_bytes=budget,
    )
    out_shape = jax.ShapeDtypeStruct((n_row_tiles, 8, 128), jnp.float32)

    if n_col_tiles == 1:
        kernel = functools.partial(_nce_loss_rows_kernel,
                                   n_total=n, batch=batch, tm=tm)
        partials = pl.pallas_call(
            kernel,
            out_shape=out_shape,
            grid=(n_row_tiles,),
            in_specs=[pl.BlockSpec((tm, c), lambda i: (i, 0))],
            out_specs=pl.BlockSpec((1, 8, 128), lambda i: (i, 0, 0)),
            compiler_params=compiler_params,
        )(similarity)
    else:
        # TODO(synk): for huge C where TM sits at the row floor, sweep
        # pipeline_mode=pl.Buffered(3) on the input spec to hide DMA latency.
        kernel = functools.partial(_nce_loss_online_kernel,
                                   n_total=n, batch=batch, c_total=c,
                                   tm=tm, tc=tc, n_col_tiles=n_col_tiles)
        partials = pl.pallas_call(
            kernel,
            out_shape=out_shape,
            grid=(n_row_tiles, n_col_tiles),
            in_specs=[pl.BlockSpec((tm, tc), lambda i, j: (i, j))],
            out_specs=pl.BlockSpec((1, 8, 128), lambda i, j: (i, 0, 0)),
            scratch_shapes=[pltpu.VMEM((tm, 1), jnp.float32),   # running max
                            pltpu.VMEM((tm, 1), jnp.float32),   # running sum
                            pltpu.VMEM((tm, 1), jnp.float32)],  # target logit
            compiler_params=compiler_params,
        )(similarity)

    # Final reduction + mean over the true row count N (kept in f32).
    return jnp.sum(partials[:, 0, 0]) / jnp.float32(n)


def _reference_loss(similarity, batch):
    n = similarity.shape[0]
    logits = similarity.astype(jnp.float32)
    labels = (jnp.arange(n) + batch) % n
    lse = jax.scipy.special.logsumexp(logits, axis=-1)
    return jnp.mean(lse - logits[jnp.arange(n), labels])


if __name__ == "__main__":
    key = jax.random.PRNGKey(0)
    k1, k2 = jax.random.split(key)

    # --- Square pairwise-similarity demo shape (matches the module's usage). ---
    batch_size = 68
    n = 2 * batch_size                      # 136 rows
    sim = jax.random.normal(k1, (n, n), dtype=jnp.float32)
    ref = _reference_loss(sim, batch_size)

    # 1) Default tiling (>= 2 row tiles so both v7x cores get work).
    loss = nce_softmax_loss(sim)
    jax.block_until_ready(loss)
    assert jnp.allclose(loss, ref, atol=1e-5, rtol=1e-5), (loss, ref)

    # 2) Forced small row tile: exercises the row grid + row-tail masking
    #    (136 = 4*32 + 8).
    loss = nce_softmax_loss(sim, tm=32)
    jax.block_until_ready(loss)
    assert jnp.allclose(loss, ref, atol=1e-5, rtol=1e-5), (loss, ref)

    # 3) bf16 streaming path (max / label select in bf16, exp/accum in f32).
    sim_bf16 = sim.astype(jnp.bfloat16)
    ref_bf16 = _reference_loss(sim_bf16, batch_size)
    loss = nce_softmax_loss(sim_bf16, tm=32)
    jax.block_until_ready(loss)
    assert jnp.allclose(loss, ref_bf16, atol=1e-4, rtol=1e-4), (loss, ref_bf16)

    # --- Online (column-tiled) logsumexp path, forced via tc. ---
    batch_size2 = 32
    n2 = 2 * batch_size2                    # 64 rows

    # 4) C a multiple of the column tile (3 column tiles, no column masking).
    sim2 = jax.random.normal(k2, (n2, 384), dtype=jnp.float32)
    ref2 = _reference_loss(sim2, batch_size2)
    loss = nce_softmax_loss(sim2, tm=32, tc=128)
    jax.block_until_ready(loss)
    assert jnp.allclose(loss, ref2, atol=1e-5, rtol=1e-5), (loss, ref2)

    # 5) Ragged C (column-tail masking on the last column tile), f32 and bf16.
    sim3 = jax.random.normal(k2, (n2, 200), dtype=jnp.float32)
    ref3 = _reference_loss(sim3, batch_size2)
    loss = nce_softmax_loss(sim3, tm=32, tc=128)
    jax.block_until_ready(loss)
    assert jnp.allclose(loss, ref3, atol=1e-5, rtol=1e-5), (loss, ref3)

    sim3_bf16 = sim3.astype(jnp.bfloat16)
    ref3_bf16 = _reference_loss(sim3_bf16, batch_size2)
    loss = nce_softmax_loss(sim3_bf16, tm=32, tc=128)
    jax.block_until_ready(loss)
    assert jnp.allclose(loss, ref3_bf16, atol=1e-4, rtol=1e-4), (loss, ref3_bf16)

    print("KERNEL_OK")
</pallas_src>

<mosaic_0001>
module attributes {stable_mosaic.version = 11 : i64} {
  func.func @_nce_loss_rows_kernel(%arg0: i32, %arg1: memref<72x136xf32, #tpu.memory_space<vmem>>, %arg2: memref<1x8x128xf32, #tpu.memory_space<vmem>>) attributes {dimension_semantics = [#tpu.dimension_semantics<parallel>], iteration_bounds = array<i64: 2>, scalar_prefetch = 0 : i64, scratch_operands = 0 : i64, tpu.core_type = #tpu.core_type<tc>, window_params = [{transform_indices = @transform_0, window_bounds = array<i64: 72, 136>}, {transform_indices = @transform_1, window_bounds = array<i64: 1, 8, 128>}]} {
    %c72_i32 = arith.constant 72 : i32
    %0 = arith.muli %arg0, %c72_i32 : i32
    %1 = tpu.iota {dimensions = array<i32: 0>} : vector<72x1xi32>
    %2 = vector.broadcast %0 : i32 to vector<72x1xi32>
    %3 = arith.addi %1, %2 : vector<72x1xi32>
    %c68_i32 = arith.constant 68 : i32
    %4 = vector.broadcast %c68_i32 : i32 to vector<72x1xi32>
    %5 = arith.addi %3, %4 : vector<72x1xi32>
    %c136_i32 = arith.constant 136 : i32
    %6 = vector.broadcast %c136_i32 : i32 to vector<72x1xi32>
    %7 = arith.cmpi sge, %5, %6 : vector<72x1xi32>
    %c136_i32_0 = arith.constant 136 : i32
    %8 = vector.broadcast %c136_i32_0 : i32 to vector<72x1xi32>
    %9 = arith.subi %5, %8 : vector<72x1xi32>
    %10 = arith.select %7, %9, %5 : vector<72x1xi1>, vector<72x1xi32>
    %c0 = arith.constant 0 : index
    %c0_1 = arith.constant 0 : index
    %11 = vector.load %arg1[%c0, %c0_1] : memref<72x136xf32, #tpu.memory_space<vmem>>, vector<72x136xf32>
    %12 = tpu.iota {dimensions = array<i32: 1>} : vector<72x136xi32>
    %13 = vector.broadcast %10 : vector<72x1xi32> to vector<72x136xi32>
    %14 = arith.cmpi eq, %12, %13 : vector<72x136xi32>
    %cst = arith.constant 0.000000e+00 : f32
    %15 = vector.broadcast %cst : f32 to vector<72x136xf32>
    %16 = arith.select %14, %11, %15 : vector<72x136xi1>, vector<72x136xf32>
    %cst_2 = arith.constant dense<0.000000e+00> : vector<72xf32>
    %17 = vector.multi_reduction <add>, %16, %cst_2 [1] : vector<72x136xf32> to vector<72xf32>
    %18 = vector.shape_cast %17 : vector<72xf32> to vector<72x1xf32>
    %cst_3 = arith.constant dense<0xFF800000> : vector<72xf32>
    %19 = vector.multi_reduction <maximumf>, %11, %cst_3 [1] : vector<72x136xf32> to vector<72xf32>
    %20 = vector.shape_cast %19 : vector<72xf32> to vector<72x1xf32>
    %21 = vector.broadcast %20 : vector<72x1xf32> to vector<72x136xf32>
    %22 = arith.subf %11, %21 : vector<72x136xf32>
    %23 = math.exp %22 : vector<72x136xf32>
    %cst_4 = arith.constant dense<0.000000e+00> : vector<72xf32>
    %24 = vector.multi_reduction <add>, %23, %cst_4 [1] : vector<72x136xf32> to vector<72xf32>
    %25 = vector.shape_cast %24 : vector<72xf32> to vector<72x1xf32>
    %26 = math.log %25 : vector<72x1xf32>
    %27 = arith.addf %20, %26 : vector<72x1xf32>
    %28 = arith.subf %27, %18 : vector<72x1xf32>
    %c136_i32_5 = arith.constant 136 : i32
    %29 = vector.broadcast %c136_i32_5 : i32 to vector<72x1xi32>
    %30 = arith.cmpi slt, %3, %29 : vector<72x1xi32>
    %cst_6 = arith.constant 0.000000e+00 : f32
    %31 = vector.broadcast %cst_6 : f32 to vector<72x1xf32>
    %32 = arith.select %30, %28, %31 : vector<72x1xi1>, vector<72x1xf32>
    %cst_7 = arith.constant dense<0.000000e+00> : vector<1xf32>
    %33 = vector.multi_reduction <add>, %32, %cst_7 [0] : vector<72x1xf32> to vector<1xf32>
    %34 = vector.shape_cast %33 : vector<1xf32> to vector<1x1xf32>
    %35 = vector.shape_cast %34 : vector<1x1xf32> to vector<1x1x1xf32>
    %36 = vector.shape_cast %35 : vector<1x1x1xf32> to vector<1x1x1xf32>
    %37 = vector.broadcast %36 : vector<1x1x1xf32> to vector<1x8x128xf32>
    %c0_8 = arith.constant 0 : index
    %c0_9 = arith.constant 0 : index
    %c0_10 = arith.constant 0 : index
    %38 = vector.load %arg2[%c0_8, %c0_9, %c0_10] : memref<1x8x128xf32, #tpu.memory_space<vmem>>, vector<1x8x128xf32>
    tpu.vector_store %arg2[%c0_8, %c0_9, %c0_10], %37 {strides = array<i32>} : memref<1x8x128xf32, #tpu.memory_space<vmem>>, vector<1x8x128xf32>,
    return
  }
  func.func @transform_0(%arg0: i32) -> (i32, i32) {
    %c0_i32 = arith.constant 0 : i32
    %c0_i32_0 = arith.constant 0 : i32
    return %arg0, %c0_i32 : i32, i32
  }
  func.func @transform_1(%arg0: i32) -> (i32, i32, i32) {
    %c0_i32 = arith.constant 0 : i32
    %c0_i32_0 = arith.constant 0 : i32
    %c0_i32_1 = arith.constant 0 : i32
    return %arg0, %c0_i32, %c0_i32_0 : i32, i32, i32
  }
}

</mosaic_0001>

<bundles_post_ra>
// kernel: tpu_custom_call.1
= control target key start
LH: loop header
LB: loop body
LE: loop exit
PB: predicated region body
PF: predicated region fallthrough
CT: control target
= control target key end

     0   :  { %6 = vsyncpa [#allocation3], 0  ;;  %s1277_s0 = inlined_call_operand.hbm [shape: f32[136,136], index: 0, kind: input, shape index: {}]   ;;  %s1278_s1 = inlined_call_operand.hbm [shape: f32[2,8,128], index: 1, kind: output, shape index: {}]  }
   0x1   :  { %8 = vsyncpa [#allocation3 + $0x1], 0 }
   0x2   :  { %9 = vsyncpa [#allocation4], 0 }
   0x3   :  { %11 = vsyncpa [#allocation4 + $0x1], 0  ;;  %s816_s6 = smov 0   ;;  %s818_s7 = smov 0  }
   0x4   :  { %s820_s8 = smov 0   ;;  %s822_s9 = smov 0  }
   0x5 LB: > { %s837_s10 = sadd.s32 4294967295, %s800_s9   ;;  %s579_s11 = sadd.s32 4294967294, %s800_s9   ;;  %s800_s9 = sphi %s822_s9, %s1288_s9   ;;  %s796_s8 = sphi %s820_s8, %s1287_s8   ;;  %s792_s7 = sphi %s818_s7, %s1286_s7   ;;  %s788_s6 = sphi %s816_s6, %s1285_s6  }
   0x6   : > { %s841_s12 = sadd.s32 1, %s800_s9   ;;  %s24_s13 = sadd.s32 1, %s796_s8 }
   0x7   : > { %s21_s14 = ssub.s32 %s800_s9, %s841_s12  ;;  %p31_p0 = scmp.ne.s32.totalorder %s796_s8, %s792_s7 }
   0x8   : > { %p22_p1 = scmp.eq.s32.totalorder %s21_s14, 0  ;;  %p32_p2 = scmp.eq.s32.totalorder %s800_s9, 0 }
   0x9   : > { %p37_p3 = scmp.ne.s32.totalorder %s792_s7, %s788_s6  ;;  %p38_p4 = scmp.eq.s32.totalorder %s837_s10, 0 }
   0xa   : > { %s853_s15 = scalar_select %p22_p1, %s796_s8, %s24_s13  }
   0xb   : > { %p33_p5 = por %p32_p2, %p31_p0  ;;  %p855_p6 = por %p38_p4, %p37_p3 }
   0xc   : > { %p61_p7 = scmp.eq.s32.totalorder %s837_s10, 1  ;;  %p67_p8 = scmp.eq.s32.totalorder %s579_s11, 1 }
   0xd   : > { %p1279_p11 = scmp.ge.s32.totalorder %s800_s9, 2 }
   0xe   : > { %p860_p9 = por %p61_p7, %p31_p0  ;;  %p864_p10 = por %p67_p8, %p37_p3 }
   0xf   : > { %83 = sbr.rel (%p1279_p11) target bundleno = 57 (0x39), region = 16 }
  0x10   : > { %s1282_s18 = scalar_select %p864_p10, 1, 0 }
  0x16   : > { %86 = sbr.rel (!%p33_p5) target bundleno = 57 (0x39), region = 20  ;;  %s87_s19 = sand.u32 (%p33_p5), 1, %s796_s8  }
  0x17   : > { %s92_s20 = smul.u32 (%p33_p5), 9, %s800_s9  ;;  %s876_s25 = scalar_lea.sflag (%p33_p5), [#allocation3], %s87_s19 }
  0x18   : > { %s608_s21 = smul.u32 (%p33_p5), 144, %s87_s19 }
  0x19   : > { %s93_s22 = ssub.s32 (%p33_p5), 17, %s92_s20 }
  0x1a   : > { %p94_p12 = scmp.lt.s32.totalorder (%p33_p5), %s93_s22, 9  ;;  %s91_s26 = scalar_lea.vmem (%p33_p5), [#allocation2], %s608_s21 }
  0x1d   : > { %s1290_s22 = smov (!%p94_p12, %s93_s22), 9 }
  0x1e   : > { %s873_s23 = sshll.u32 %s1290_s22, 8 }
  0x1f   : > { %s99_s24 = ssub.s32 2304, %s873_s23 }
  0x20   : > { %100 = vsyncadd %s876_s25, %s99_s24  ;;  %p584_p13 = scmp.ne.s32.totalorder %s873_s23, 0  ;;  %s607_s27 = smul.u32 2304, %s800_s9 }
  0x21   : > { %s106_s28 = sshll.u32 %s91_s26, 4  ;;  %s710_s11 = scalar_lea.hbm %s1277_s0, 4352  ;;  %s886_s28 = int_to_ptr.vmem [resolvable:$true] %s106_s28 }
  0x22   : > { %s884_s2 = scalar_lea.hbm %s1277_s0, %s607_s27 }
  0x23   : > { %s706_s3 = scalar_lea.hbm %s884_s2, %s873_s23  ;;  %p711_p3 = scmp.lt.u32.totalorder %s884_s2, %s1277_s0 }
  0x24   : > { %p707_p0 = scmp.ne.s32.totalorder %s884_s2, %s706_s3  ;;  %p712_p4 = scmp.lt.u32.totalorder %s710_s11, %s706_s3 }
  0x25   : > { %p714_p7 = scmp.lt.u32.totalorder %s706_s3, %s884_s2 }
  0x26   : > { %p708_p1 = pnand %p707_p0, %p584_p13  ;;  %p713_p5 = por %p712_p4, %p711_p3 }
  0x28   : > { %p709_p2 = pneg %p708_p1  ;;  %p715_p8 = por %p714_p7, %p713_p5 }
  0x2a   : > { %p716_p12 = pnand %p715_p8, %p709_p2 }
  0x2c   : > { %719 = shalt.err (!%p716_p12)
}
  0x2d   : > { %s720_s19 = scalar_lea.vmem %s886_s28, %s873_s23  ;;  %s802_s20 = smov [#allocation2]  }
  0x2e   : > { %p721_p0 = scmp.ne.s32.totalorder %s886_s28, %s720_s19  ;;  %s724_s21 = sshll.u32 %s802_s20, 4  ;;  %s725_s21 = int_to_ptr.vmem [resolvable:$false] %s724_s21 }
  0x2f   : > { %s726_s22 = scalar_lea.vmem %s725_s21, 4608  ;;  %p727_p10 = scmp.lt.s32.totalorder %s886_s28, %s725_s21 }
  0x30   : > { %p722_p1 = pnand %p721_p0, %p584_p13  ;;  %p728_p3 = scmp.lt.s32.totalorder %s726_s22, %s720_s19 }
  0x32   : > { %p723_p11 = pneg %p722_p1  ;;  %p729_p4 = por %p728_p3, %p727_p10 }
  0x34   : > { %p730_p5 = pnand %p729_p4, %p723_p11 }
  0x36   : > { %733 = shalt.err (!%p730_p5)
}
  0x37   : > { %s803_s24 = smov 256   ;;  %s804_s26 = smov 16  }
  0x38   : > { %112 = dma.hbm_to_vmem [thread:$0]  (%p584_p13), %s884_s2, %s873_s23, %s886_s28, %s876_s25, %s803_s24, %s803_s24, %s804_s26  }
  0x39 PF: > { %p589_p2 = scmp.ge.s32.totalorder %s800_s9, 1  ;;  %p114_p7 = scmp.lt.s32.totalorder %s800_s9, 3 }
  0x3b   : > { %p115_p8 = pnand %p589_p2, %p114_p7 }
  0x3c   : > { %s916_s27 = sand.u32 (!%p115_p8), 1, %s792_s7  }
  0x3d   : > { %118 = sbr.rel (%p115_p8) target bundleno = 444 (0x1bc), region = 24  ;;  %s121_s30 = scalar_lea.sflag (!%p115_p8), [#allocation3], %s916_s27 }
  0x3e   : > { %s609_s29 = smul.u32 (!%p115_p8), 144, %s916_s27 }
  0x40   : > { %s920_s3 = scalar_lea.vmem (!%p115_p8), [#allocation2], %s609_s29 }
  0x44   : > { %779 = dma.done.wait (%p855_p6), %s121_s30, 2304  }
  0x45   : > { %781 = vsyncadd (%p855_p6), %s121_s30, 4294964992  ;;  %vm263_vm0 = vcmask 64512   ;;  %v927_v0 = vld [vmem:[%s920_s3] sm:$0xff]  ;;  %v930_v1 = vld [vmem:[%s920_s3 + $0x8] sm:$0xff]  ;;  %v150_v36 = vlaneseq  ;;  %s149_s16 = smul.u32 72, %s837_s10  ;;  %s590_s23 = sshll.u32 %s916_s27, 3 }
  0x46   : > { %v933_v2 = vld [vmem:[%s920_s3 + $0x20] sm:$0xff]  ;;  %v300_v3 = vsel %vm263_vm0, %v930_v1, -inf  ;;  %v938_v4 = vld [vmem:[%s920_s3 + $0x28] sm:$0xff]  ;;  %v941_v5 = vld [vmem:[%s920_s3 + $0x10] sm:$0xff]  ;;  %s601_s25 = sshll.u32 %s837_s10, 7  ;;  %s142_s28 = scalar_lea.vmem [#allocation5], %s590_s23 }
  0x47   : > { %v944_v6 = vld [vmem:[%s920_s3 + $0x18] sm:$0xff]  ;;  %v301_v7 = vmax.f32 %v927_v0, %v300_v3  ;;  %v308_v8 = vsel %vm263_vm0, %v938_v4, -inf  ;;  %v952_v10 = vld [vmem:[%s920_s3 + $0x30] sm:$0xff]  ;;  %v961_v14 = vld [vmem:[%s920_s3 + $0x48] sm:$0xff]  ;;  %v1007_v37 = vshrl.u32 %v150_v36, 7  ;;  %v1011_v39 = vstv %s149_s16  ;;  %s509_s2 = sshll.u32 %s142_s28, 4  ;;  %s1233_s11 = scalar_lea.hbm %s1278_s1, %s601_s25  ;;  %s1235_s2 = int_to_ptr.vmem [resolvable:$true] %s509_s2 }
  0x48   : > { %v304_v9 = vsel %vm263_vm0, %v944_v6, -inf  ;;  %v955_v11 = vld [vmem:[%s920_s3 + $0x38] sm:$0xff]  ;;  %v309_v12 = vmax.f32 %v933_v2, %v308_v8  ;;  %v969_v18 = vld [vmem:[%s920_s3 + $0x40] sm:$0xff]  ;;  %v316_v19 = vsel %vm263_vm0, %v961_v14, -inf  ;;  %v974_v20 = vld [vmem:[%s920_s3 + $0x50] sm:$0xff]  ;;  %v1036_v55 = vand.u32 127, %v150_v36 }
  0x49   : > { %v312_v13 = vsel %vm263_vm0, %v955_v11, -inf  ;;  %v964_v15 = vld [vmem:[%s920_s3 + $0x58] sm:$0xff]  ;;  %302 = vmax.xlane.f32.xlu0 %v301_v7  ;;  %v305_v16 = vmax.f32 %v941_v5, %v304_v9  ;;  %v979_v22 = vld [vmem:[%s920_s3 + $0x68] sm:$0xff]  ;;  %v317_v24 = vmax.f32 %v969_v18, %v316_v19  ;;  %v987_v26 = vld [vmem:[%s920_s3 + $0x60] sm:$0xff]  ;;  %v152_v38 = vadd.s32 8, %v1007_v37  ;;  %s496_s13 = scalar_lea.sflag [#allocation4], %s916_s27 }
  0x4a   : > { %310 = vmax.xlane.f32.xlu1 %v309_v12  ;;  %v313_v17 = vmax.f32 %v952_v10, %v312_v13  ;;  %v320_v21 = vsel %vm263_vm0, %v964_v15, -inf  ;;  %v982_v23 = vld [vmem:[%s920_s3 + $0x78] sm:$0xff]  ;;  %v324_v27 = vsel %vm263_vm0, %v979_v22, -inf  ;;  %v992_v28 = vld [vmem:[%s920_s3 + $0x70] sm:$0xff]  ;;  %v997_v30 = vld [vmem:[%s920_s3 + $0x88] sm:$0xff]  ;;  %v1018_v41 = vadd.s32 %v1011_v39, %v1007_v37  ;;  %s734_s14 = scalar_lea.vmem %s1235_s2, 128 }
  0x4b   : > { %v321_v25 = vmax.f32 %v974_v20, %v320_v21  ;;  %v328_v29 = vsel %vm263_vm0, %v982_v23, -inf  ;;  %v325_v31 = vmax.f32 %v987_v26, %v324_v27  ;;  %v1002_v33 = vld [vmem:[%s920_s3 + $0x80] sm:$0xff]  ;;  %v332_v34 = vsel %vm263_vm0, %v997_v30, -inf  ;;  %p735_p6 = scmp.ne.s32.totalorder %s1235_s2, %s734_s14  ;;  %s805_s10 = smov [#allocation5]  }
  0x4c   : > { %v329_v32 = vmax.f32 %v992_v28, %v328_v29  ;;  %v333_v35 = vmax.f32 %v1002_v33, %v332_v34  ;;  %v1014_v40 = vadd.s32 %v1011_v39, %v152_v38  ;;  %v170_v44 = vadd.s32 68, %v1018_v41  ;;  %s738_s19 = sshll.u32 %s805_s10, 4  ;;  %s739_s19 = int_to_ptr.vmem [resolvable:$false] %s738_s19 }
  0x4d   : > { %306 = vmax.xlane.f32.xlu0 %v305_v16  ;;  %v154_v45 = vadd.s32 24, %v1007_v37  ;;  %v153_v49 = vadd.s32 16, %v1007_v37  ;;  %v1059_v19 = vadd.s32 128, %v1036_v55  ;;  %p736_p10 = pnand %p735_p6, %p860_p9  ;;  %s740_s20 = scalar_lea.vmem %s739_s19, 256 }
  0x4e   : > { %314 = vmax.xlane.f32.xlu1 %v313_v17  ;;  %v171_v42 = vadd.s32 68, %v1014_v40  ;;  %v591_v59 = vadd.s32 4294967160, %v170_v44  ;;  %vm179_vm2 = vcmp.ge.s32.totalorder %v170_v44, 136  ;;  %p741_p13 = scmp.lt.s32.totalorder %s1235_s2, %s739_s19  ;;  %p742_p12 = scmp.lt.s32.totalorder %s740_s20, %s734_s14 }
  0x4f   : > { %v1041_v60 = vadd.s32 %v1011_v39, %v154_v45  ;;  %v1050_v3 = vadd.s32 %v1011_v39, %v153_v49  ;;  %p737_p11 = pneg %p736_p10 }
  0x50   : > { %v592_v54 = vadd.s32 4294967160, %v171_v42  ;;  %vm180_vm1 = vcmp.ge.s32.totalorder %v171_v42, 136  ;;  %p743_p0 = por %p742_p12, %p741_p13 }
  0x51   : > { %318 = vmax.xlane.f32.xlu0 %v317_v24  ;;  %v1076_v36 = vadd.s32 68, %v1041_v60 }
  0x52   : > { %322 = vmax.xlane.f32.xlu1 %v321_v25  ;;  %v1067_v27 = vsel %vm180_vm1, %v592_v54, %v171_v42  ;;  %p744_p1 = pnand %p743_p0, %p737_p11 }
  0x53   : > { %vm230_vm3 = vcmp.eq.s32.totalorder %v1059_v19, %v1067_v27  ;;  %vm229_vm5 = vcmp.eq.s32.totalorder %v1036_v55, %v1067_v27  ;;  %vm182_vm6 = vcmp.ge.s32.totalorder %v1076_v36, 136 }
  0x55   : > { %326 = vmax.xlane.f32.xlu0 %v325_v31 }
  0x56   : > { %330 = vmax.xlane.f32.xlu1 %v329_v32  ;;  %v1073_v32 = vsel %vm179_vm2, %v591_v59, %v170_v44 }
  0x57   : > { %vm228_vm4 = vcmp.eq.s32.totalorder %v1059_v19, %v1073_v32  ;;  %vm227_vm8 = vcmp.eq.s32.totalorder %v1036_v55, %v1073_v32 }
  0x59   : > { %334 = vmax.xlane.f32.xlu0 %v333_v35 }
  0xd6   : > { %v1021_v43 = vpop.xlane.xlu0 %302 }
  0xd7   : > { %v336_v46 = vsub.f32 %v927_v0, %v1021_v43  ;;  %v337_v47 = vsub.f32 %v930_v1, %v1021_v43  ;;  %v1029_v48 = vpop.xlane.xlu1 %310 }
  0xd8   : > { %v340_v50 = vsub.f32 %v933_v2, %v1029_v48  ;;  %v341_v51 = vsub.f32 %v938_v4, %v1029_v48 }
  0xd9   : > { %v354_v52 = vmul.f32 1.442695, %v336_v46  ;;  %v356_v53 = vmul.f32 1.442695, %v337_v47  ;;  %v1081_v46 = vadd.s32 68, %v1050_v3 }
  0xda   : > { %v362_v56 = vmul.f32 1.442695, %v340_v50  ;;  %v364_v57 = vmul.f32 1.442695, %v341_v51  ;;  %v1038_v58 = vpop.xlane.xlu0 %306  ;;  %v156_v50 = vadd.s32 40, %v1007_v37 }
  0xdb   : > { %652 = vpow2.f32 %v354_v52  ;;  %v338_v61 = vsub.f32 %v941_v5, %v1038_v58  ;;  %v339_v62 = vsub.f32 %v944_v6, %v1038_v58  ;;  %v1047_v63 = vpop.xlane.xlu1 %314  ;;  %vm181_vm7 = vcmp.ge.s32.totalorder %v1081_v46, 136 }
  0xdc   : > { %654 = vpow2.f32 %v356_v53  ;;  %v342_v7 = vsub.f32 %v952_v10, %v1047_v63  ;;  %v343_v8 = vsub.f32 %v955_v11, %v1047_v63  ;;  %v155_v53 = vadd.s32 32, %v1007_v37 }
  0xdd   : > { %656 = vpow2.f32 %v362_v56  ;;  %v358_v9 = vmul.f32 1.442695, %v338_v61  ;;  %v360_v12 = vmul.f32 1.442695, %v339_v62 }
  0xde   : > { %658 = vpow2.f32 %v364_v57  ;;  %v366_v13 = vmul.f32 1.442695, %v342_v7  ;;  %v368_v16 = vmul.f32 1.442695, %v343_v8  ;;  %v1056_v17 = vpop.xlane.xlu0 %318 }
  0xdf   : > { %660 = vpow2.f32 %v358_v9  ;;  %v344_v21 = vsub.f32 %v969_v18, %v1056_v17  ;;  %v345_v24 = vsub.f32 %v961_v14, %v1056_v17  ;;  %v1065_v25 = vpop.xlane.xlu1 %322 }
  0xe0   : > { %662 = vpow2.f32 %v360_v12  ;;  %v346_v29 = vsub.f32 %v974_v20, %v1065_v25  ;;  %v347_v31 = vsub.f32 %v964_v15, %v1065_v25 }
  0xe1   : > { %664 = vpow2.f32 %v366_v13  ;;  %v370_v34 = vmul.f32 1.442695, %v344_v21  ;;  %v372_v35 = vmul.f32 1.442695, %v345_v24  ;;  %v1107_v24 = vadd.s32 %v1011_v39, %v156_v50 }
  0xe2   : > { %666 = vpow2.f32 %v368_v16  ;;  %v374_v38 = vmul.f32 1.442695, %v346_v29  ;;  %v376_v45 = vmul.f32 1.442695, %v347_v31  ;;  %v1078_v42 = vpop.xlane.xlu0 %326  ;;  %v1110_v29 = vadd.s32 %v1011_v39, %v155_v53 }
  0xe3   : > { %668 = vpow2.f32 %v370_v34  ;;  %v348_v47 = vsub.f32 %v987_v26, %v1078_v42  ;;  %v349_v44 = vsub.f32 %v979_v22, %v1078_v42  ;;  %v1087_v49 = vpop.xlane.xlu1 %330  ;;  %v594_v53 = vadd.s32 4294967160, %v1076_v36 }
  0xe4   : > { %670 = vpow2.f32 %v372_v35  ;;  %v350_v51 = vsub.f32 %v992_v28, %v1087_v49  ;;  %v351_v52 = vsub.f32 %v982_v23, %v1087_v49 }
  0xe5   : > { %v653_v54 = vpop.eup %652  ;;  %672 = vpow2.f32 %v374_v38  ;;  %v378_v56 = vmul.f32 1.442695, %v348_v47  ;;  %v380_v57 = vmul.f32 1.442695, %v349_v44  ;;  %v158_v44 = vadd.s32 56, %v1007_v37 }
  0xe6   : > { %v655_v59 = vpop.eup %654  ;;  %674 = vpow2.f32 %v376_v45  ;;  %v382_v61 = vmul.f32 1.442695, %v350_v51  ;;  %v384_v62 = vmul.f32 1.442695, %v351_v52  ;;  %v1097_v7 = vpop.xlane.xlu0 %334  ;;  %v157_v51 = vadd.s32 48, %v1007_v37 }
  0xe7   : > { %v657_v8 = vpop.eup %656  ;;  %676 = vpow2.f32 %v378_v56  ;;  %v352_v9 = vsub.f32 %v1002_v33, %v1097_v7  ;;  %v353_v12 = vsub.f32 %v997_v30, %v1097_v7  ;;  %v390_v13 = vsel %vm263_vm0, %v655_v59, 0.0 }
  0xe8   : > { %v659_v16 = vpop.eup %658  ;;  %678 = vpow2.f32 %v380_v57  ;;  %v391_v21 = vadd.f32 %v653_v54, %v390_v13  ;;  %v593_v57 = vadd.s32 4294967160, %v1081_v46  ;;  %v175_v59 = vadd.s32 68, %v1107_v24 }
  0xe9   : > { %v661_v31 = vpop.eup %660  ;;  %680 = vpow2.f32 %v382_v61  ;;  %v386_v34 = vmul.f32 1.442695, %v352_v9  ;;  %v388_v35 = vmul.f32 1.442695, %v353_v12  ;;  %v398_v38 = vsel %vm263_vm0, %v659_v16, 0.0 }
  0xea   : > { %v663_v45 = vpop.eup %662  ;;  %682 = vpow2.f32 %v384_v62  ;;  %392 = vadd.xlane.f32.xlu1 %v391_v21  ;;  %v399_v47 = vadd.f32 %v657_v8, %v398_v38  ;;  %v174_v8 = vadd.s32 68, %v1110_v29  ;;  %v1126_v13 = vadd.s32 %v1011_v39, %v158_v44 }
  0xeb   : > { %v665_v52 = vpop.eup %664  ;;  %684 = vpow2.f32 %v386_v34  ;;  %v394_v50 = vsel %vm263_vm0, %v663_v45, 0.0  ;;  %v1129_v16 = vadd.s32 %v1011_v39, %v157_v51  ;;  %v159_v21 = vadd.s32 64, %v1007_v37 }
  0xec   : > { %v667_v54 = vpop.eup %666  ;;  %686 = vpow2.f32 %v388_v35  ;;  %v395_v56 = vadd.f32 %v661_v31, %v394_v50  ;;  %v248_v35 = vsel %vm230_vm3, %v944_v6, 0.0  ;;  %v246_v38 = vsel %vm228_vm4, %v930_v1, 0.0 }
  0xed   : > { %v669_v61 = vpop.eup %668  ;;  %v402_v62 = vsel %vm263_vm0, %v667_v54, 0.0  ;;  %v200_v37 = vsel %vm182_vm6, %v594_v53, %v1076_v36  ;;  %v199_v44 = vsel %vm181_vm7, %v593_v57, %v1081_v46  ;;  %vm184_vm9 = vcmp.ge.s32.totalorder %v175_v59, 136 }
  0xee   : > { %v671_v9 = vpop.eup %670  ;;  %400 = vadd.xlane.f32.xlu1 %v399_v47  ;;  %396 = vadd.xlane.f32.xlu0 %v395_v56  ;;  %v403_v12 = vadd.f32 %v665_v52, %v402_v62  ;;  %v596_v52 = vadd.s32 4294967160, %v175_v59  ;;  %vm183_vm10 = vcmp.ge.s32.totalorder %v174_v8, 136  ;;  %v595_v50 = vadd.s32 4294967160, %v174_v8 }
  0xef   : > { %v673_v31 = vpop.eup %672  ;;  %v406_v34 = vsel %vm263_vm0, %v671_v9, 0.0  ;;  %v177_v56 = vadd.s32 68, %v1126_v13  ;;  %v1153_v36 = vadd.s32 %v1011_v39, %v159_v21  ;;  %v247_v57 = vsel %vm229_vm5, %v941_v5, 0.0 }
  0xf0   : > { %v675_v45 = vpop.eup %674  ;;  %v407_v47 = vadd.f32 %v669_v61, %v406_v34  ;;  %v176_v61 = vadd.s32 68, %v1129_v16  ;;  %v268_v62 = vsel %vm263_vm0, %v248_v35, 0.0  ;;  %v264_v39 = vsel %vm263_vm0, %v246_v38, 0.0 }
  0xf1   : > { %v677_v6 = vpop.eup %676  ;;  %v410_v51 = vsel %vm263_vm0, %v675_v45, 0.0  ;;  %vm234_vm11 = vcmp.eq.s32.totalorder %v1059_v19, %v200_v37  ;;  %vm232_vm12 = vcmp.eq.s32.totalorder %v1059_v19, %v199_v44  ;;  %v202_v5 = vsel %vm184_vm9, %v596_v52, %v175_v59 }
  0xf2   : > { %v679_v54 = vpop.eup %678  ;;  %404 = vadd.xlane.f32.xlu0 %v403_v12  ;;  %408 = vadd.xlane.f32.xlu1 %v407_v47  ;;  %v411_v1 = vadd.f32 %v673_v31, %v410_v51  ;;  %v245_v31 = vsel %vm227_vm8, %v927_v0, 0.0  ;;  %v201_v27 = vsel %vm183_vm10, %v595_v50, %v174_v8  ;;  %v598_v47 = vadd.s32 4294967160, %v177_v56 }
  0xf3   : > { %v681_v53 = vpop.eup %680  ;;  %v414_v46 = vsel %vm263_vm0, %v679_v54, 0.0  ;;  %v597_v32 = vadd.s32 4294967160, %v176_v61  ;;  %v178_v0 = vadd.s32 68, %v1153_v36  ;;  %vm233_vm13 = vcmp.eq.s32.totalorder %v1036_v55, %v200_v37 }
  0xf4   : > { %v683_v9 = vpop.eup %682  ;;  %v415_v12 = vadd.f32 %v677_v6, %v414_v46  ;;  %vm186_vm14 = vcmp.ge.s32.totalorder %v177_v56, 136  ;;  %vm185_vm15 = vcmp.ge.s32.totalorder %v176_v61, 136  ;;  %v252_v59 = vsel %vm234_vm11, %v955_v11, 0.0 }
  0xf5   : > { %v685_v21 = vpop.eup %684  ;;  %v418_v34 = vsel %vm263_vm0, %v683_v9, 0.0  ;;  %vm231_vm1 = vcmp.eq.s32.totalorder %v1036_v55, %v199_v44  ;;  %v250_v8 = vsel %vm232_vm12, %v938_v4, 0.0  ;;  %v269_v51 = vadd.f32 %v268_v62, %v247_v57 }
  0xf6   : > { %v687_v35 = vpop.eup %686  ;;  %412 = vadd.xlane.f32.xlu0 %v411_v1  ;;  %416 = vadd.xlane.f32.xlu1 %v415_v12  ;;  %v419_v45 = vadd.f32 %v681_v53, %v418_v34  ;;  %v265_v52 = vadd.f32 %v264_v39, %v245_v31  ;;  %vm238_vm2 = vcmp.eq.s32.totalorder %v1059_v19, %v202_v5  ;;  %v251_v50 = vsel %vm233_vm13, %v952_v10, 0.0 }
  0xf7   : > { %v422_v38 = vsel %vm263_vm0, %v687_v35, 0.0  ;;  %vm236_vm3 = vcmp.eq.s32.totalorder %v1059_v19, %v201_v27  ;;  %v204_v54 = vsel %vm186_vm14, %v598_v47, %v177_v56  ;;  %v203_v1 = vsel %vm185_vm15, %v597_v32, %v176_v61 }
  0xf8   : > { %v423_v6 = vadd.f32 %v685_v21, %v422_v38  ;;  %v599_v37 = vadd.s32 4294967160, %v178_v0  ;;  %v276_v11 = vsel %vm263_vm0, %v252_v59, 0.0  ;;  %v249_v53 = vsel %vm231_vm1, %v933_v2, 0.0 }
  0xf9   : > { %v272_v44 = vsel %vm263_vm0, %v250_v8, 0.0  ;;  %vm187_vm4 = vcmp.ge.s32.totalorder %v178_v0, 136  ;;  %vm237_vm5 = vcmp.eq.s32.totalorder %v1036_v55, %v202_v5  ;;  %v256_v4 = vsel %vm238_vm2, %v964_v15, 0.0 }
  0xfa   : > { %420 = vadd.xlane.f32.xlu0 %v419_v45  ;;  %424 = vadd.xlane.f32.xlu1 %v423_v6  ;;  %vm235_vm6 = vcmp.eq.s32.totalorder %v1036_v55, %v201_v27  ;;  %v254_v46 = vsel %vm236_vm3, %v961_v14, 0.0  ;;  %vm242_vm7 = vcmp.eq.s32.totalorder %v1059_v19, %v204_v54  ;;  %vm240_vm8 = vcmp.eq.s32.totalorder %v1059_v19, %v203_v1 }
  0xfb   : > { %v277_v10 = vadd.f32 %v276_v11, %v251_v50  ;;  %v273_v56 = vadd.f32 %v272_v44, %v249_v53  ;;  %v205_v2 = vsel %vm187_vm4, %v599_v37, %v178_v0  ;;  %v255_v61 = vsel %vm237_vm5, %v974_v20, 0.0 }
  0xfc   : > { %v284_v57 = vsel %vm263_vm0, %v256_v4, 0.0  ;;  %v253_v62 = vsel %vm235_vm6, %v969_v18, 0.0  ;;  %v280_v15 = vsel %vm263_vm0, %v254_v46, 0.0  ;;  %vm241_vm9 = vcmp.eq.s32.totalorder %v1036_v55, %v204_v54 }
  0xfd   : > { %v260_v14 = vsel %vm242_vm7, %v982_v23, 0.0  ;;  %vm239_vm10 = vcmp.eq.s32.totalorder %v1036_v55, %v203_v1  ;;  %v258_v9 = vsel %vm240_vm8, %v979_v22, 0.0  ;;  %vm244_vm11 = vcmp.eq.s32.totalorder %v1059_v19, %v205_v2 }
  0xfe   : > { %270 = vadd.xlane.f32.xlu1 %v269_v51  ;;  %266 = vadd.xlane.f32.xlu0 %v265_v52  ;;  %v285_v12 = vadd.f32 %v284_v57, %v255_v61  ;;  %v281_v20 = vadd.f32 %v280_v15, %v253_v62  ;;  %v259_v31 = vsel %vm241_vm9, %v992_v28, 0.0  ;;  %v292_v18 = vsel %vm263_vm0, %v260_v14, 0.0 }
  0xff   : > { %v257_v39 = vsel %vm239_vm10, %v987_v26, 0.0  ;;  %v288_v21 = vsel %vm263_vm0, %v258_v9, 0.0  ;;  %vm243_vm12 = vcmp.eq.s32.totalorder %v1036_v55, %v205_v2  ;;  %v262_v23 = vsel %vm244_vm11, %v997_v30, 0.0 }
 0x100   : > { %v293_v22 = vadd.f32 %v292_v18, %v259_v31  ;;  %v289_v19 = vadd.f32 %v288_v21, %v257_v39  ;;  %v261_v34 = vsel %vm243_vm12, %v1002_v33, 0.0  ;;  %v296_v5 = vsel %vm263_vm0, %v262_v23, 0.0 }
 0x101   : > { %v297_v28 = vadd.f32 %v296_v5, %v261_v34  ;;  %vm463_vm0 = vcmp.lt.s32.totalorder %v1014_v40, 136  ;;  %vm462_vm13 = vcmp.lt.s32.totalorder %v1018_v41, 136  ;;  %vm464_vm14 = vcmp.lt.s32.totalorder %v1050_v3, 136 }
 0x102   : > { %278 = vadd.xlane.f32.xlu1 %v277_v10  ;;  %274 = vadd.xlane.f32.xlu0 %v273_v56  ;;  %vm465_vm15 = vcmp.lt.s32.totalorder %v1041_v60, 136  ;;  %vm466_vm1 = vcmp.lt.s32.totalorder %v1110_v29, 136  ;;  %vm467_vm2 = vcmp.lt.s32.totalorder %v1107_v24, 136  ;;  %vm468_vm3 = vcmp.lt.s32.totalorder %v1129_v16, 136 }
 0x103   : > { %vm469_vm4 = vcmp.lt.s32.totalorder %v1126_v13, 136  ;;  %vm470_vm5 = vcmp.lt.s32.totalorder %v1153_v36, 136 }
 0x106   : > { %286 = vadd.xlane.f32.xlu1 %v285_v12  ;;  %282 = vadd.xlane.f32.xlu0 %v281_v20 }
 0x10a   : > { %294 = vadd.xlane.f32.xlu1 %v293_v22  ;;  %290 = vadd.xlane.f32.xlu0 %v289_v19 }
 0x10e   : > { %298 = vadd.xlane.f32.xlu0 %v297_v28 }
 0x177   : > { %v393_v27 = vpop.xlane.xlu1 %392 }
 0x178   : > { %688 = vlog2.f32 %v393_v27 }
 0x17b   : > { %v401_v26 = vpop.xlane.xlu1 %400  ;;  %v397_v35 = vpop.xlane.xlu0 %396 }
 0x17c   : > { %690 = vlog2.f32 %v401_v26 }
 0x17d   : > { %692 = vlog2.f32 %v397_v35 }
 0x17f   : > { %v409_v55 = vpop.xlane.xlu1 %408  ;;  %v405_v30 = vpop.xlane.xlu0 %404 }
 0x180   : > { %694 = vlog2.f32 %v409_v55 }
 0x181   : > { %696 = vlog2.f32 %v405_v30 }
 0x182   : > { %v689_v45 = vpop.eup %688 }
 0x183   : > { %v417_v47 = vpop.xlane.xlu1 %416  ;;  %v413_v32 = vpop.xlane.xlu0 %412  ;;  %v427_v0 = vmul.f32 0.6931472, %v689_v45 }
 0x184   : > { %698 = vlog2.f32 %v417_v47 }
 0x185   : > { %700 = vlog2.f32 %v413_v32  ;;  %v444_v54 = vadd.f32 %v427_v0, %v1021_v43 }
 0x186   : > { %v691_v33 = vpop.eup %690 }
 0x187   : > { %v693_v38 = vpop.eup %692  ;;  %v425_v6 = vpop.xlane.xlu1 %424  ;;  %v431_v51 = vmul.f32 0.6931472, %v691_v33 }
 0x188   : > { %v421_v59 = vpop.xlane.xlu0 %420  ;;  %v429_v8 = vmul.f32 0.6931472, %v693_v38  ;;  %702 = vlog2.f32 %v425_v6 }
 0x189   : > { %704 = vlog2.f32 %v421_v59  ;;  %v446_v46 = vadd.f32 %v431_v51, %v1029_v48 }
 0x18a   : > { %v695_v52 = vpop.eup %694  ;;  %v445_v50 = vadd.f32 %v429_v8, %v1038_v58 }
 0x18b   : > { %v697_v1 = vpop.eup %696  ;;  %v271_v37 = vpop.xlane.xlu1 %270  ;;  %v435_v56 = vmul.f32 0.6931472, %v695_v52 }
 0x18c   : > { %v267_v11 = vpop.xlane.xlu0 %266  ;;  %v433_v53 = vmul.f32 0.6931472, %v697_v1  ;;  %v454_v44 = vsub.f32 %v445_v50, %v271_v37 }
 0x18d   : > { %v453_v4 = vsub.f32 %v444_v54, %v267_v11  ;;  %v448_v31 = vadd.f32 %v435_v56, %v1056_v17 }
 0x18e   : > { %v699_v10 = vpop.eup %698  ;;  %v472_v2 = vsel %vm463_vm0, %v454_v44, 0.0  ;;  %v447_v58 = vadd.f32 %v433_v53, %v1047_v63 }
 0x18f   : > { %v471_v61 = vsel %vm462_vm13, %v453_v4, 0.0  ;;  %v701_v57 = vpop.eup %700  ;;  %v279_v43 = vpop.xlane.xlu1 %278  ;;  %v439_v12 = vmul.f32 0.6931472, %v699_v10 }
 0x190   : > { %v275_v40 = vpop.xlane.xlu0 %274  ;;  %v437_v62 = vmul.f32 0.6931472, %v701_v57  ;;  %v456_v15 = vsub.f32 %v447_v58, %v279_v43  ;;  %v480_v14 = vadd.f32 %v472_v2, %v471_v61 }
 0x191   : > { %v455_v41 = vsub.f32 %v446_v46, %v275_v40 }
 0x192   : > { %v703_v9 = vpop.eup %702  ;;  %v449_v20 = vadd.f32 %v437_v62, %v1065_v25  ;;  %v474_v23 = vsel %vm465_vm15, %v456_v15, 0.0  ;;  %v450_v25 = vadd.f32 %v439_v12, %v1078_v42 }
 0x193   : > { %v473_v48 = vsel %vm464_vm14, %v455_v41, 0.0  ;;  %v705_v18 = vpop.eup %704  ;;  %v287_v39 = vpop.xlane.xlu1 %286  ;;  %v443_v34 = vmul.f32 0.6931472, %v703_v9 }
 0x194   : > { %v481_v63 = vadd.f32 %v480_v14, %v473_v48  ;;  %v283_v3 = vpop.xlane.xlu0 %282  ;;  %v441_v21 = vmul.f32 0.6931472, %v705_v18  ;;  %v458_v22 = vsub.f32 %v449_v20, %v287_v39 }
 0x195   : > { %v457_v19 = vsub.f32 %v448_v31, %v283_v3  ;;  %v452_v45 = vadd.f32 %v443_v34, %v1097_v7 }
 0x196   : > { %v482_v60 = vadd.f32 %v481_v63, %v474_v23  ;;  %v451_v28 = vadd.f32 %v441_v21, %v1087_v49  ;;  %v476_v29 = vsel %vm467_vm2, %v458_v22, 0.0 }
 0x197   : > { %v475_v5 = vsel %vm466_vm1, %v457_v19, 0.0  ;;  %v295_v27 = vpop.xlane.xlu1 %294 }
 0x198   : > { %v483_v17 = vadd.f32 %v482_v60, %v475_v5  ;;  %v291_v26 = vpop.xlane.xlu0 %290  ;;  %v460_v35 = vsub.f32 %v451_v28, %v295_v27 }
 0x199   : > { %v459_v55 = vsub.f32 %v450_v25, %v291_v26 }
 0x19a   : > { %v484_v30 = vadd.f32 %v483_v17, %v476_v29  ;;  %v478_v49 = vsel %vm469_vm4, %v460_v35, 0.0 }
 0x19b   : > { %v477_v24 = vsel %vm468_vm3, %v459_v55, 0.0 }
 0x19c   : > { %v485_v47 = vadd.f32 %v484_v30, %v477_v24  ;;  %v299_v42 = vpop.xlane.xlu0 %298 }
 0x19d   : > { %v461_v32 = vsub.f32 %v452_v45, %v299_v42 }
 0x19e   : > { %v486_v33 = vadd.f32 %v485_v47, %v478_v49 }
 0x19f   : > { %v479_v16 = vsel %vm470_vm5, %v461_v32, 0.0 }
 0x1a0   : > { %v487_v0 = vadd.f32 %v486_v33, %v479_v16 }
 0x1a2   : > { %v488_v38 = vrot.slane %v487_v0, 4 }
 0x1a4   : > { %v489_v6 = vadd.f32 %v488_v38, %v487_v0 }
 0x1a6   : > { %v490_v13 = vrot.slane %v489_v6, 2 }
 0x1a8   : > { %v491_v59 = vadd.f32 %v490_v13, %v489_v6 }
 0x1aa   : > { %v492_v7 = vrot.slane %v491_v59, 1 }
 0x1ac   : > { %v493_v8 = vadd.f32 %v492_v7, %v491_v59 }
 0x1ae   : > { %494 = vst [vmem:[%s142_s28] sm:$0xff] %v493_v8 }
 0x1af   : > { %747 = shalt.err (!%p744_p1)
}
 0x1b0   : > { %s748_s21 = scalar_lea.hbm %s1233_s11, 128  ;;  %s752_s26 = scalar_lea.hbm %s1278_s1, 256 }
 0x1b1   : > { %p749_p3 = scmp.ne.s32.totalorder %s1233_s11, %s748_s21  ;;  %p753_p2 = scmp.lt.u32.totalorder %s1233_s11, %s1278_s1 }
 0x1b2   : > { %p754_p7 = scmp.lt.u32.totalorder %s752_s26, %s748_s21  ;;  %p756_p6 = scmp.lt.u32.totalorder %s748_s21, %s1233_s11 }
 0x1b3   : > { %p750_p4 = pnand %p749_p3, %p860_p9 }
 0x1b4   : > { %p755_p8 = por %p754_p7, %p753_p2 }
 0x1b5   : > { %p751_p5 = pneg %p750_p4 }
 0x1b6   : > { %p757_p10 = por %p756_p6, %p755_p8 }
 0x1b8   : > { %p758_p11 = pnand %p757_p10, %p751_p5 }
 0x1ba   : > { %761 = shalt.err (!%p758_p11)
}
 0x1bb   : > { %611 = dma.vmem_to_hbm [thread:$0]  (%p860_p9), %s1235_s2, 128, %s1233_s11, %s496_s13  }
 0x1bc PF: > { %s521_s30 = sand.u32 1, %s788_s6   ;;  %p1283_p13 = scmp.ne.s32.totalorder %s1282_s18, 0 }
 0x1bd   : > { %p1284_p12 = scmp.ge.s32.totalorder %s800_s9, 2  ;;  %s522_s3 = scalar_lea.sflag [#allocation4], %s521_s30 }
 0x1bf   : > { %p614_p0 = pnand %p1284_p12, %p1283_p13 }
 0x1c1   : > { %783 = dma.done.wait (!%p614_p0), %s522_s3, 128  }
 0x1c2   : > { %785 = vsyncadd (!%p614_p0), %s522_s3, 4294967168  ;;  %p14_p1 = scmp.ge.s32.totalorder %s841_s12, 4   ;;  %s1285_s6 = smov %s792_s7 }
 0x1c3   : > { %s1286_s7 = smov %s796_s8  ;;  %s1287_s8 = smov %s853_s15 }
 0x1c4   : > { %s1288_s9 = smov %s841_s12  ;;  %16 = sbr.rel (!%p14_p1) target bundleno = 5 (0x5), region = 69 }
 0x1cb   :  { %527 = vsyncpa [#allocation3], 1 }
 0x1cc   :  { %529 = vsyncpa [#allocation3 + $0x1], 1 }
 0x1cd   :  { %530 = vsyncpa [#allocation4], 1 }
 0x1ce   :  { %532 = vsyncpa [#allocation4 + $0x1], 1 }

</bundles_post_ra>
